<compile_context>
chip_gen: v7x
topology: tpu7x:2x2x1
jax: 0.10.0
libtpu: 0.0.40
codegen_flags: <defaults>
</compile_context>

<pallas_src>
import functools

import jax
import jax.numpy as jnp
from jax.experimental import pallas as pl
from jax.experimental.pallas import tpu as pltpu


def _pathmax_kernel(x_ref, o_ref, *, waitk, tt_blk, ts):
    # x_ref: (1, TT_BLK, Ts, C)   o_ref: (1, TT_BLK, C)
    x = x_ref[0]                                  # (TT_BLK, Ts, C)
    dtype = x.dtype

    # Global target index of every local row of this block.
    t_base = pl.program_id(1) * tt_blk
    t_idx = jax.lax.broadcasted_iota(jnp.int32, (tt_blk, ts, 1), 0) + t_base
    s_idx = jax.lax.broadcasted_iota(jnp.int32, (tt_blk, ts, 1), 1)
    keep = s_idx < (t_idx + waitk)                # (TT_BLK, Ts, 1), broadcasts over C

    if jnp.issubdtype(dtype, jnp.floating):
        # Faithful to torch: add a {0, -inf} mask, then max-reduce.
        add_mask = jnp.where(keep, jnp.array(0, dtype), jnp.array(-jnp.inf, dtype))
        masked = x + add_mask
    else:
        # Integer inputs: select the dtype's minimum as the masked identity.
        masked = jnp.where(keep, x, jnp.array(jnp.iinfo(dtype).min, dtype))

    # Reduce over the source (sublane) axis.
    o_ref[0] = jnp.max(masked, axis=1)


def _pick_tt_block(Tt, Ts, C, itemsize, target_bytes=2 << 20):
    """Largest Tt-chunk whose (TT_BLK, Ts, C) input tile is ~target_bytes."""
    row_bytes = max(1, Ts * C * itemsize)
    blk = max(1, target_bytes // row_bytes)
    if blk >= Tt:
        return Tt                       # full axis: block dim == array dim
    blk = max(8, (blk // 8) * 8)        # keep output block sublane-aligned
    return Tt if blk >= Tt else blk


def path_max(x, waitk=3, need_attention_weights=False):
    """Pallas implementation of PathMAX.forward. Returns (xpool, None)."""
    if need_attention_weights:
        # TODO(synk): argmax-index histogram attention branch not implemented.
        raise NotImplementedError("need_attention_weights=True is not supported")

    B, Tt, Ts, C = x.shape
    tt_blk = _pick_tt_block(Tt, Ts, C, x.dtype.itemsize)
    n_tt = (Tt + tt_blk - 1) // tt_blk

    kernel = functools.partial(_pathmax_kernel, waitk=waitk, tt_blk=tt_blk, ts=Ts)

    out = pl.pallas_call(
        kernel,
        out_shape=jax.ShapeDtypeStruct((B, Tt, C), x.dtype),
        grid_spec=pltpu.PrefetchScalarGridSpec(
            num_scalar_prefetch=0,
            grid=(B, n_tt),
            in_specs=[
                pl.BlockSpec((1, tt_blk, Ts, C), lambda b, t: (b, t, 0, 0)),
            ],
            out_specs=pl.BlockSpec((1, tt_blk, C), lambda b, t: (b, t, 0)),
        ),
        compiler_params=pltpu.CompilerParams(
            dimension_semantics=("parallel", "parallel"),
            vmem_limit_bytes=32 * 1024 * 1024,
        ),
    )(x)
    return out, None


def _reference(x, waitk):
    # Pure-JAX reference matching the PyTorch forward:
    # (x + triu(-inf, diag=waitk)).max(dim=2)
    B, Tt, Ts, C = x.shape
    t = jnp.arange(Tt)[:, None]
    s = jnp.arange(Ts)[None, :]
    mask = jnp.where((s - t) >= waitk, -jnp.inf, 0.0).astype(x.dtype)
    return jnp.max(x + mask[None, :, :, None], axis=2)


if __name__ == "__main__":
    key = jax.random.PRNGKey(0)
    B, Tt, Ts, C = 2, 4, 8, 32
    waitk = 3
    x = jax.random.normal(key, (B, Tt, Ts, C), dtype=jnp.float32)

    xpool, attn = path_max(x, waitk=waitk)
    xpool = jax.block_until_ready(xpool)

    ref = _reference(x, waitk)
    assert attn is None
    assert xpool.shape == (B, Tt, C) and xpool.dtype == x.dtype
    assert jnp.allclose(xpool, ref), "mismatch vs reference masked max"

    print("KERNEL_OK")
</pallas_src>

<mosaic_0001>
module attributes {stable_mosaic.version = 11 : i64} {
  func.func @_pathmax_kernel(%arg0: i32, %arg1: i32, %arg2: memref<1x4x8x32xf32, #tpu.memory_space<vmem>>, %arg3: memref<1x4x32xf32, #tpu.memory_space<vmem>>) attributes {dimension_semantics = [#tpu.dimension_semantics<parallel>, #tpu.dimension_semantics<parallel>], iteration_bounds = array<i64: 2, 1>, scalar_prefetch = 0 : i64, scratch_operands = 0 : i64, tpu.core_type = #tpu.core_type<tc>, window_params = [{transform_indices = @transform_0, window_bounds = array<i64: 1, 4, 8, 32>}, {transform_indices = @transform_1, window_bounds = array<i64: 1, 4, 32>}]} {
    %c0 = arith.constant 0 : index
    %c0_0 = arith.constant 0 : index
    %c0_1 = arith.constant 0 : index
    %c0_2 = arith.constant 0 : index
    %0 = vector.load %arg2[%c0, %c0_0, %c0_1, %c0_2] : memref<1x4x8x32xf32, #tpu.memory_space<vmem>>, vector<1x4x8x32xf32>
    %1 = vector.shape_cast %0 : vector<1x4x8x32xf32> to vector<4x8x32xf32>
    %c4_i32 = arith.constant 4 : i32
    %2 = arith.muli %arg1, %c4_i32 : i32
    %3 = tpu.iota {dimensions = array<i32: 0>} : vector<4x8x1xi32>
    %4 = vector.broadcast %2 : i32 to vector<4x8x1xi32>
    %5 = arith.addi %3, %4 : vector<4x8x1xi32>
    %6 = tpu.iota {dimensions = array<i32: 1>} : vector<4x8x1xi32>
    %c3_i32 = arith.constant 3 : i32
    %7 = vector.broadcast %c3_i32 : i32 to vector<4x8x1xi32>
    %8 = arith.addi %5, %7 : vector<4x8x1xi32>
    %9 = arith.cmpi slt, %6, %8 : vector<4x8x1xi32>
    %cst = arith.constant 0.000000e+00 : f32
    %cst_3 = arith.constant 0xFF800000 : f32
    %10 = vector.broadcast %cst : f32 to vector<4x8x1xf32>
    %11 = vector.broadcast %cst_3 : f32 to vector<4x8x1xf32>
    %12 = arith.select %9, %10, %11 : vector<4x8x1xi1>, vector<4x8x1xf32>
    %13 = vector.broadcast %12 : vector<4x8x1xf32> to vector<4x8x32xf32>
    %14 = arith.addf %1, %13 : vector<4x8x32xf32>
    %cst_4 = arith.constant dense<0xFF800000> : vector<4x32xf32>
    %15 = vector.multi_reduction <maximumf>, %14, %cst_4 [1] : vector<4x8x32xf32> to vector<4x32xf32>
    %c0_5 = arith.constant 0 : index
    %c0_6 = arith.constant 0 : index
    %c0_7 = arith.constant 0 : index
    %16 = vector.load %arg3[%c0_5, %c0_6, %c0_7] : memref<1x4x32xf32, #tpu.memory_space<vmem>>, vector<1x4x32xf32>
    %17 = vector.shape_cast %16 : vector<1x4x32xf32> to vector<4x32xf32>
    %18 = vector.shape_cast %15 : vector<4x32xf32> to vector<1x4x32xf32>
    tpu.vector_store %arg3[%c0_5, %c0_6, %c0_7], %18 {strides = array<i32>} : memref<1x4x32xf32, #tpu.memory_space<vmem>>, vector<1x4x32xf32>,
    return
  }
  func.func @transform_0(%arg0: i32, %arg1: i32) -> (i32, i32, i32, i32) {
    %c0_i32 = arith.constant 0 : i32
    %c0_i32_0 = arith.constant 0 : i32
    %c0_i32_1 = arith.constant 0 : i32
    return %arg0, %arg1, %c0_i32, %c0_i32_0 : i32, i32, i32, i32
  }
  func.func @transform_1(%arg0: i32, %arg1: i32) -> (i32, i32, i32) {
    %c0_i32 = arith.constant 0 : i32
    %c0_i32_0 = arith.constant 0 : i32
    return %arg0, %arg1, %c0_i32 : i32, i32, i32
  }
}

</mosaic_0001>

<bundles_post_ra>
// kernel: tpu_custom_call.1
= control target key start
LH: loop header
LB: loop body
LE: loop exit
PB: predicated region body
PF: predicated region fallthrough
CT: control target
= control target key end

     0   :  { %6 = vsyncpa [#allocation3], 0  ;;  %s702_s0 = inlined_call_operand.hbm [shape: f32[2,4,8,32], index: 0, kind: input, shape index: {}]   ;;  %s703_s1 = inlined_call_operand.hbm [shape: f32[2,4,32], index: 1, kind: output, shape index: {}]  }
   0x1   :  { %8 = vsyncpa [#allocation3 + $0x1], 0 }
   0x2   :  { %9 = vsyncpa [#allocation4], 0 }
   0x3   :  { %11 = vsyncpa [#allocation4 + $0x1], 0  ;;  %s528_s6 = smov 0   ;;  %s530_s7 = smov 0  }
   0x4   :  { %s532_s8 = smov 0   ;;  %s534_s9 = smov 0  }
   0x5   :  { %s536_s10 = smov 0   ;;  %s538_s11 = smov 0  }
   0x6 LB: > { %s319_s12 = sadd.s32 4294967295, %s511_s11   ;;  %s320_s13 = sadd.s32 4294967294, %s511_s11   ;;  %s511_s11 = sphi %s538_s11, %s17_s11   ;;  %s507_s10 = sphi %s536_s10, %s718_s10   ;;  %s503_s9 = sphi %s534_s9, %s717_s9   ;;  %s499_s8 = sphi %s532_s8, %s716_s8   ;;  %s495_s7 = sphi %s530_s7, %s715_s7   ;;  %s491_s6 = sphi %s528_s6, %s714_s6  }
   0x7   : > { %s29_s14 = sadd.s32 1, %s507_s10  ;;  %s38_s15 = sadd.s32 1, %s499_s8 }
   0x8   : > { %p31_p0 = scmp.ge.s32.totalorder %s29_s14, 2  ;;  %p45_p1 = scmp.ne.s32.totalorder %s499_s8, %s495_s7 }
   0x9   : > { %p46_p2 = scmp.eq.s32.totalorder %s511_s11, 0  ;;  %p51_p3 = scmp.ne.s32.totalorder %s495_s7, %s491_s6 }
   0xa   : > { %s720_s14 = smov (%p31_p0, %s29_s14), 0  ;;  %p52_p5 = scmp.eq.s32.totalorder %s319_s12, 0 }
   0xb   : > { %p569_p4 = por %p46_p2, %p45_p1  ;;  %s33_s17 = ssub.s32 %s507_s10, %s720_s14 }
   0xc   : > { %p77_p6 = scmp.eq.s32.totalorder %s319_s12, 1  ;;  %p36_p7 = scmp.eq.s32.totalorder %s33_s17, 0 }
   0xd   : > { %p575_p8 = por %p52_p5, %p51_p3  ;;  %p83_p10 = scmp.eq.s32.totalorder %s320_s13, 1 }
   0xe   : > { %p579_p9 = por %p77_p6, %p45_p1  ;;  %p346_p13 = scmp.lt.s32.totalorder %s511_s11, 2 }
   0xf   : > { %s584_s20 = scalar_select %p36_p7, %s499_s8, %s38_s15  }
  0x10   : > { %s707_s19 = scalar_select %p579_p9, 1, 0 }
  0x11   : > { %p586_p11 = por %p83_p10, %p51_p3  ;;  %s103_s22 = sand.u32 1, %s499_s8  }
  0x12   : > { %s323_s23 = sshll.u32 %s103_s22, 5  ;;  %s333_s24 = sshll.u32 %s507_s10, 9 }
  0x13   : > { %s708_s21 = scalar_select %p586_p11, 1, 0 }
  0x14   : > { %s597_s27 = scalar_lea.hbm %s702_s0, %s333_s24  ;;  %s107_s28 = scalar_lea.vmem [#allocation2], %s323_s23 }
  0x15   : > { %s116_s29 = sshll.u32 %s107_s28, 4  ;;  %p603_p0 = pnand %p346_p13, %p569_p4  ;;  %s599_s29 = int_to_ptr.vmem [resolvable:$true] %s116_s29 }
  0x16   : > { %s608_s2 = scalar_lea.sflag [#allocation3], %s103_s22  ;;  %s399_s3 = scalar_lea.hbm %s597_s27, 512 }
  0x17   : > { %p400_p2 = scmp.ne.s32.totalorder %s597_s27, %s399_s3  ;;  %p401_p3 = pneg %p603_p0 }
  0x18   : > { %s404_s12 = scalar_lea.hbm %s702_s0, 1024  ;;  %p405_p4 = scmp.lt.u32.totalorder %s597_s27, %s702_s0 }
  0x19   : > { %p402_p5 = pnand %p401_p3, %p400_p2  ;;  %p406_p7 = scmp.lt.u32.totalorder %s404_s12, %s399_s3 }
  0x1a   : > { %p408_p13 = scmp.lt.u32.totalorder %s399_s3, %s597_s27 }
  0x1b   : > { %p403_p6 = pneg %p402_p5  ;;  %p407_p10 = por %p406_p7, %p405_p4 }
  0x1d   : > { %p409_p12 = por %p408_p13, %p407_p10 }
  0x1f   : > { %p410_p1 = pnand %p409_p12, %p403_p6 }
  0x21   : > { %413 = shalt.err (!%p410_p1)
}
  0x22   : > { %s414_s16 = scalar_lea.vmem %s599_s29, 512  ;;  %s513_s17 = smov [#allocation2]  }
  0x23   : > { %p415_p2 = scmp.ne.s32.totalorder %s599_s29, %s414_s16  ;;  %s419_s22 = sshll.u32 %s513_s17, 4  ;;  %s420_s22 = int_to_ptr.vmem [resolvable:$false] %s419_s22 }
  0x24   : > { %s421_s23 = scalar_lea.vmem %s420_s22, 1024  ;;  %p422_p9 = scmp.lt.s32.totalorder %s599_s29, %s420_s22 }
  0x25   : > { %p417_p5 = pnand %p415_p2, %p401_p3  ;;  %p423_p4 = scmp.lt.s32.totalorder %s421_s23, %s414_s16 }
  0x27   : > { %p418_p11 = pneg %p417_p5  ;;  %p424_p7 = por %p423_p4, %p422_p9 }
  0x29   : > { %p425_p10 = pnand %p424_p7, %p418_p11 }
  0x2b   : > { %428 = shalt.err (!%p425_p10)
}
  0x2c   : > { %s514_s24 = smov 128   ;;  %s515_s25 = smov 8  }
  0x2d   : > { %341 = dma.hbm_to_vmem [thread:$0]  (!%p603_p0), %s597_s27, 512, %s599_s29, %s608_s2, %s514_s24, %s514_s24, %s515_s25  }
  0x2e   : > { %p124_p12 = scmp.lt.s32.totalorder %s511_s11, 3  ;;  %p710_p1 = scmp.ge.s32.totalorder %s511_s11, 1 }
  0x30   : > { %p125_p3 = pnand %p710_p1, %p124_p12 }
  0x31   : > { %s640_s26 = sand.u32 (!%p125_p3), 1, %s495_s7  }
  0x32   : > { %128 = sbr.rel (%p125_p3) target bundleno = 96 (0x60), region = 24  ;;  %s327_s28 = sshll.u32 (!%p125_p3), %s640_s26, 5 }
  0x33   : > { %s131_s3 = scalar_lea.sflag (!%p125_p3), [#allocation3], %s640_s26  ;;  %s134_s4 = scalar_lea.vmem (!%p125_p3), [#allocation2], %s327_s28 }
  0x39   : > { %482 = dma.done.wait (%p575_p8), %s131_s3, 512  }
  0x3a   : > { %484 = vsyncadd (%p575_p8), %s131_s3, 4294966784  ;;  %v163_v0 = vlaneseq  ;;  %v516_v2 = vmov -inf   ;;  %v154_v7 = vld [vmem:[%s134_s4] sm:$0xff]  ;;  %v155_v8 = vld [vmem:[%s134_s4 + $0x8] sm:$0xff]  ;;  %vm180_vm4 = vcmask 261120   ;;  %s328_s18 = sshll.u32 %s640_s26, 2 }
  0x3b   : > { %v156_v9 = vld [vmem:[%s134_s4 + $0x10] sm:$0xff]  ;;  %v157_v10 = vld [vmem:[%s134_s4 + $0x18] sm:$0xff]  ;;  %vm213_vm5 = vcmask 1041409   ;;  %vm215_vm6 = vcmask 1042434   ;;  %s152_s27 = scalar_lea.vmem [#allocation5], %s328_s18  ;;  %s330_s30 = sshll.u32 %s503_s9, 6 }
  0x3c   : > { %v164_v1 = vshrl.u32 %v163_v0, 7  ;;  %s237_s29 = sshll.u32 %s152_s27, 4  ;;  %vm217_vm7 = vcmask 1043459   ;;  %vm220_vm8 = vcmask 257024   ;;  %s655_s12 = scalar_lea.hbm %s703_s1, %s330_s30  ;;  %s650_s29 = int_to_ptr.vmem [resolvable:$true] %s237_s29 }
  0x3d   : > { %s223_s13 = scalar_lea.sflag [#allocation4], %s640_s26  ;;  %s429_s15 = scalar_lea.vmem %s650_s29, 64 }
  0x3e   : > { %vm168_vm0 = vcmp.lt.s32.totalorder %v164_v1, 3  ;;  %vm169_vm1 = vcmp.lt.s32.totalorder %v164_v1, 4  ;;  %vm170_vm2 = vcmp.lt.s32.totalorder %v164_v1, 5  ;;  %vm171_vm3 = vcmp.lt.s32.totalorder %v164_v1, 6  ;;  %p430_p8 = scmp.ne.s32.totalorder %s650_s29, %s429_s15  ;;  %p711_p9 = scmp.ne.s32.totalorder %s707_s19, 0 }
  0x3f   : > { %v172_v3 = vsel %vm168_vm0, 0.0, %v516_v2  ;;  %v173_v4 = vsel %vm169_vm1, 0.0, %v516_v2  ;;  %v174_v5 = vsel %vm170_vm2, 0.0, %v516_v2  ;;  %v175_v6 = vsel %vm171_vm3, 0.0, %v516_v2  ;;  %s517_s9 = smov [#allocation5]  }
  0x40   : > { %v176_v11 = vadd.f32 %v172_v3, %v154_v7  ;;  %v177_v12 = vadd.f32 %v173_v4, %v155_v8  ;;  %v178_v13 = vadd.f32 %v174_v5, %v156_v9  ;;  %v179_v14 = vadd.f32 %v175_v6, %v157_v10  ;;  %p431_p11 = pnand %p430_p8, %p711_p9  ;;  %s433_s16 = sshll.u32 %s517_s9, 4  ;;  %s434_s16 = int_to_ptr.vmem [resolvable:$false] %s433_s16 }
  0x41   : > { %s435_s17 = scalar_lea.vmem %s434_s16, 128  ;;  %p436_p6 = scmp.lt.s32.totalorder %s650_s29, %s434_s16 }
  0x42   : > { %v181_v15 = vsel %vm180_vm4, %v176_v11, -inf  ;;  %v188_v16 = vsel %vm180_vm4, %v177_v12, -inf  ;;  %v195_v17 = vsel %vm180_vm4, %v178_v13, -inf  ;;  %v202_v21 = vsel %vm180_vm4, %v179_v14, -inf  ;;  %p432_p0 = pneg %p431_p11  ;;  %p437_p13 = scmp.lt.s32.totalorder %s435_s17, %s429_s15 }
  0x43   : > { %v182_v18 = vrot.slane %v181_v15, 4  ;;  %v189_v19 = vrot.slane %v188_v16, 4  ;;  %v196_v20 = vrot.slane %v195_v17, 4  ;;  %v203_v22 = vrot.slane %v202_v21, 4 }
  0x44   : > { %p438_p2 = por %p437_p13, %p436_p6 }
  0x45   : > { %v183_v23 = vmax.f32 %v181_v15, %v182_v18  ;;  %v190_v24 = vmax.f32 %v188_v16, %v189_v19  ;;  %v197_v25 = vmax.f32 %v195_v17, %v196_v20  ;;  %v204_v26 = vmax.f32 %v202_v21, %v203_v22 }
  0x46   : > { %p439_p5 = pnand %p438_p2, %p432_p0 }
  0x47   : > { %v184_v27 = vrot.slane %v183_v23, 2  ;;  %v191_v28 = vrot.slane %v190_v24, 2  ;;  %v198_v29 = vrot.slane %v197_v25, 2  ;;  %v205_v30 = vrot.slane %v204_v26, 2 }
  0x49   : > { %v185_v31 = vmax.f32 %v183_v23, %v184_v27  ;;  %v192_v32 = vmax.f32 %v190_v24, %v191_v28  ;;  %v199_v33 = vmax.f32 %v197_v25, %v198_v29  ;;  %v206_v34 = vmax.f32 %v204_v26, %v205_v30 }
  0x4b   : > { %v186_v35 = vrot.slane %v185_v31, 1  ;;  %v193_v36 = vrot.slane %v192_v32, 1  ;;  %v200_v37 = vrot.slane %v199_v33, 1  ;;  %v207_v38 = vrot.slane %v206_v34, 1 }
  0x4d   : > { %v187_v39 = vmax.f32 %v185_v31, %v186_v35  ;;  %v194_v40 = vmax.f32 %v192_v32, %v193_v36  ;;  %v201_v41 = vmax.f32 %v199_v33, %v200_v37  ;;  %v208_v42 = vmax.f32 %v206_v34, %v207_v38 }
  0x4f   : > { %v214_v43 = vsel %vm213_vm5, %v194_v40, %v187_v39 }
  0x50   : > { %v216_v44 = vsel %vm215_vm6, %v201_v41, %v214_v43 }
  0x51   : > { %v218_v45 = vsel %vm217_vm7, %v208_v42, %v216_v44 }
  0x52   : > { %221 = vst.msk [vmem:[%s152_s27] sm:$0xf] %vm220_vm8, %v218_v45 }
  0x53   : > { %442 = shalt.err (!%p439_p5)
}
  0x54   : > { %s443_s22 = scalar_lea.hbm %s655_s12, 64  ;;  %s447_s25 = scalar_lea.hbm %s703_s1, 128 }
  0x55   : > { %p444_p4 = scmp.ne.s32.totalorder %s655_s12, %s443_s22  ;;  %p448_p12 = scmp.lt.u32.totalorder %s655_s12, %s703_s1 }
  0x56   : > { %p449_p1 = scmp.lt.u32.totalorder %s447_s25, %s443_s22  ;;  %p451_p8 = scmp.lt.u32.totalorder %s443_s22, %s655_s12 }
  0x57   : > { %p445_p7 = pnand %p444_p4, %p711_p9 }
  0x58   : > { %p450_p3 = por %p449_p1, %p448_p12 }
  0x59   : > { %p446_p10 = pneg %p445_p7 }
  0x5a   : > { %p452_p11 = por %p451_p8, %p450_p3 }
  0x5c   : > { %p453_p0 = pnand %p452_p11, %p446_p10 }
  0x5e   : > { %456 = shalt.err (!%p453_p0)
}
  0x5f   : > { %336 = dma.vmem_to_hbm [thread:$0]  (%p711_p9), %s650_s29, 64, %s655_s12, %s223_s13  }
  0x60 PF: > { %s249_s3 = sand.u32 1, %s491_s6   ;;  %p712_p6 = scmp.ne.s32.totalorder %s708_s21, 0 }
  0x61   : > { %p713_p13 = scmp.ge.s32.totalorder %s511_s11, 2  ;;  %s250_s4 = scalar_lea.sflag [#allocation4], %s249_s3 }
  0x63   : > { %p343_p2 = pnand %p713_p13, %p712_p6 }
  0x65   : > { %486 = dma.done.wait (!%p343_p2), %s250_s4, 64  }
  0x66   : > { %488 = vsyncadd (!%p343_p2), %s250_s4, 4294967232  ;;  %s17_s11 = sadd.s32 1, %s511_s11   ;;  %s714_s6 = smov %s495_s7 }
  0x67   : > { %p14_p5 = scmp.ge.s32.totalorder %s17_s11, 4   ;;  %s715_s7 = smov %s499_s8 }
  0x68   : > { %s716_s8 = smov %s584_s20  ;;  %s717_s9 = smov %s507_s10 }
  0x69   : > { %s718_s10 = smov %s720_s14  ;;  %16 = sbr.rel (!%p14_p5) target bundleno = 6 (0x6), region = 69 }
  0x70   :  { %255 = vsyncpa [#allocation3], 1 }
  0x71   :  { %257 = vsyncpa [#allocation3 + $0x1], 1 }
  0x72   :  { %258 = vsyncpa [#allocation4], 1 }
  0x73   :  { %260 = vsyncpa [#allocation4 + $0x1], 1 }

</bundles_post_ra>
